<compile_context>
chip_gen: v5e
topology: v5e:2x2
jax: 0.10.0
libtpu: 0.0.40
codegen_flags: <defaults>
</compile_context>

<pallas_src>
import functools

import jax
import jax.numpy as jnp
from jax.experimental import pallas as pl
from jax.experimental.pallas import tpu as pltpu

_MIB = 1024 * 1024


# ---------------------------------------------------------------------------
# Kernel A: center EMA update (streamed reduction over teacher rows).
# grid = (column_chunks [parallel], row_tiles [arbitrary/reduction]).
# ---------------------------------------------------------------------------
def _center_kernel(teacher_ref, center_ref, center_out_ref, *, momentum, scale):
    @pl.when(pl.program_id(1) == 0)
    def _():
        center_out_ref[...] = center_ref[...].astype(jnp.float32) * momentum

    tile_sum = jnp.sum(teacher_ref[...].astype(jnp.float32), axis=0, keepdims=True)
    center_out_ref[...] += tile_sum * scale


# ---------------------------------------------------------------------------
# Kernel B: fused teacher softmax / student softmax stats / pairwise CE.
# grid = (batch_row_tiles [parallel], global + local crops [arbitrary]).
# ---------------------------------------------------------------------------
def _loss_kernel(student_ref, teacher_ref, center_ref, out_ref,
                 s_sum_ref, logz_sum_ref, t_sum_ref, corr_ref, *,
                 global_crop_nums, inv_student_temp, inv_teacher_temp):
    c = pl.program_id(1)
    n_crops = pl.num_programs(1)

    @pl.when(c == 0)
    def _():
        s_sum_ref[...] = jnp.zeros_like(s_sum_ref)
        logz_sum_ref[...] = jnp.zeros_like(logz_sum_ref)
        t_sum_ref[...] = jnp.zeros_like(t_sum_ref)
        corr_ref[...] = jnp.zeros_like(corr_ref)

    # Student softmax statistics for (crop c, this batch-row tile).
    # Temperature as a precomputed reciprocal multiply (no per-element divide).
    # s_logsm = s_shift - logZ is never materialized (shift-invariant algebra).
    s = student_ref[...].astype(jnp.float32) * inv_student_temp
    s_max = jnp.max(s, axis=-1, keepdims=True)
    s_shift = s - s_max
    logz = jnp.log(jnp.sum(jnp.exp(s_shift), axis=-1, keepdims=True))  # [TB, 1]
    s_sum_ref[...] += s_shift
    logz_sum_ref[...] += logz

    # Teacher crops coincide with the first `global_crop_nums` student crops.
    @pl.when(c < global_crop_nums)
    def _():
        t = (teacher_ref[...].astype(jnp.float32)
             - center_ref[...].astype(jnp.float32)) * inv_teacher_temp
        t_max = jnp.max(t, axis=-1, keepdims=True)
        t_exp = jnp.exp(t - t_max)
        denom = jnp.sum(t_exp, axis=-1, keepdims=True)
        # per-row reciprocal instead of a [TB, D] divide
        t_soft = t_exp * pl.reciprocal(denom, approx=False)
        t_sum_ref[...] += t_soft
        # "diagonal" term: t_soft . s_logsm = t_soft . s_shift - logZ
        # (each t_soft row sums to 1).
        corr_ref[...] += jnp.sum(t_soft * s_shift, axis=-1, keepdims=True) - logz

    @pl.when(c == n_crops - 1)
    def _():
        # cross = t_sum . s_logsm_sum
        #       = t_sum . s_shift_sum - G * logZ_sum     (t_sum rows sum to G)
        cross = (jnp.sum(t_sum_ref[...] * s_sum_ref[...], axis=-1, keepdims=True)
                 - float(global_crop_nums) * logz_sum_ref[...])
        per_row = corr_ref[...] - cross                       # [TB, 1]
        # lane-dense store: per-row loss replicated across 128 lanes
        out_ref[...] = jnp.broadcast_to(per_row, out_ref.shape)


# ---------------------------------------------------------------------------
# VMEM budgeting: generation-aware (v5e/v6e 128 MiB, v7x 64 MiB per TC).
# ---------------------------------------------------------------------------
def _vmem_capacity_bytes():
    try:
        return int(pltpu.get_tpu_info().vmem_capacity_bytes)
    except Exception:
        return 64 * _MIB  # conservative (v7x-class) fallback


def _pick_tile_rows(total_rows, row_bytes, budget_bytes, cap_rows=None):
    """Largest multiple-of-8 divisor of total_rows whose per-row working set
    fits budget_bytes (optionally capped so >=2 row tiles exist for megacore)."""
    cap = total_rows if cap_rows is None else max(8, min(total_rows, cap_rows))
    best = None
    tb = 8
    while tb <= cap:
        if total_rows % tb == 0 and tb * row_bytes <= budget_bytes:
            best = tb
        tb += 8
    if best is None:
        raise ValueError(
            f"an 8-row tile needs {8 * row_bytes} bytes but the VMEM tile "
            f"budget is {budget_bytes} bytes; reduce planes or feed bf16 preds")
    return best


def dino_loss(student_preds, teacher_preds, center, epoch, *,
              planes, global_crop_nums=2, local_crop_nums=8,
              warmup_teacher_temp_epochs=0, teacher_temp=0.04,
              student_temp=0.1, center_momentum=0.9, device_count=1,
              max_tile_rows=None):
    """Returns (loss_scalar, updated_center[1, planes])."""
    n_teacher = teacher_preds.shape[0]
    n_crops = global_crop_nums + local_crop_nums
    assert n_teacher % global_crop_nums == 0
    batch_per_crop = n_teacher // global_crop_nums
    assert student_preds.shape[0] == n_crops * batch_per_crop
    assert student_preds.shape[1] == planes and teacher_preds.shape[1] == planes
    assert planes % 128 == 0, "planes must be a multiple of 128 (lane axis)"
    assert batch_per_crop % 8 == 0, "batch per crop must be a multiple of 8"
    # TODO(synk): pad ragged batch/planes instead of asserting.

    # Per-step teacher temperature (matches the module's warmup expression;
    # epoch=0 with warmup>0 yields temp=0 exactly as the PyTorch code would).
    if epoch < warmup_teacher_temp_epochs:
        per_step_teacher_temp = epoch / warmup_teacher_temp_epochs * teacher_temp
    else:
        per_step_teacher_temp = teacher_temp

    # ---- generation-aware VMEM budget --------------------------------------
    vmem_cap = _vmem_capacity_bytes()
    # v5e/v6e (128 MiB) -> limit 96 MiB, budget 80 MiB;
    # v7x    ( 64 MiB) -> limit 48 MiB, budget 32 MiB (headroom for Mosaic
    # internal elementwise temporaries / semaphores).
    vmem_limit_bytes = int(min(vmem_cap * 3 // 4, 96 * _MIB))
    tile_budget = int(max(16 * _MIB, vmem_limit_bytes - 16 * _MIB))

    s_itemsize = jnp.dtype(student_preds.dtype).itemsize
    t_itemsize = jnp.dtype(teacher_preds.dtype).itemsize

    # ---- Kernel A: center EMA (the softmax below uses the *updated* center,
    #      exactly like the PyTorch forward which calls update_center first).
    # TODO(synk): torch.distributed.all_reduce across devices is an identity
    # here (single device); device_count stands in for cuda.device_count().
    scale = (1.0 - center_momentum) / float(n_teacher * device_count)

    # Column-split gives v7x's second TensorCore work; neutral on 1-TC chips.
    n_col = 2 if planes % 256 == 0 else 1
    col_tile = planes // n_col
    row_bytes_a = 2 * col_tile * t_itemsize              # double-buffered teacher
    fixed_a = 4 * col_tile * 4 + 2 * col_tile * 4        # out + center buffers
    tile_rows_a = _pick_tile_rows(n_teacher, row_bytes_a, tile_budget - fixed_a)

    new_center = pl.pallas_call(
        functools.partial(_center_kernel, momentum=float(center_momentum),
                          scale=float(scale)),
        out_shape=jax.ShapeDtypeStruct((1, planes), jnp.float32),
        grid=(n_col, n_teacher // tile_rows_a),
        in_specs=[pl.BlockSpec((tile_rows_a, col_tile), lambda j, i: (i, j)),
                  pl.BlockSpec((1, col_tile), lambda j, i: (0, j))],
        out_specs=pl.BlockSpec((1, col_tile), lambda j, i: (0, j)),
        compiler_params=pltpu.CompilerParams(
            dimension_semantics=("parallel", "arbitrary"),
            vmem_limit_bytes=vmem_limit_bytes),
    )(teacher_preds, center)

    # ---- Kernel B: fused loss ----------------------------------------------
    in_itemsize = max(s_itemsize, t_itemsize)
    row_bytes_b = (planes * (4 * in_itemsize   # student + teacher, double-buffered
                             + 2 * 4           # s_sum + t_sum f32 scratch
                             + 2 * 4)          # headroom: f32 elementwise temps
                   + 2 * 128 * 4 + 2 * 4)      # out block (x2) + per-row scalars
    fixed_b = 2 * planes * 4                   # constant center block
    # Cap at half the per-crop batch so the parallel row-tile axis has >= 2
    # steps (keeps both v7x TensorCores busy); costs <1 extra grid step on 1-TC
    # chips.  TODO(synk): for batch_per_crop == 8 a planes-split online softmax
    # would be needed to expose parallelism; not worth it at these sizes.
    cap_b = batch_per_crop // 2 if batch_per_crop >= 16 else batch_per_crop
    if max_tile_rows is not None:
        cap_b = min(cap_b, max_tile_rows)
    tile_rows = _pick_tile_rows(batch_per_crop, row_bytes_b,
                                tile_budget - fixed_b, cap_rows=cap_b)
    tiles_per_crop = batch_per_crop // tile_rows

    kernel = functools.partial(
        _loss_kernel,
        global_crop_nums=global_crop_nums,
        inv_student_temp=float(1.0 / student_temp),
        inv_teacher_temp=float(1.0 / per_step_teacher_temp),
    )

    def student_map(i, c):
        return (c * tiles_per_crop + i, 0)

    def teacher_map(i, c):
        # clamp so c >= G keeps the previous teacher block resident (no refetch)
        return (jnp.minimum(c, global_crop_nums - 1) * tiles_per_crop + i, 0)

    partials = pl.pallas_call(
        kernel,
        out_shape=jax.ShapeDtypeStruct((batch_per_crop, 128), jnp.float32),
        grid=(tiles_per_crop, n_crops),
        in_specs=[pl.BlockSpec((tile_rows, planes), student_map),
                  pl.BlockSpec((tile_rows, planes), teacher_map),
                  pl.BlockSpec((1, planes), lambda i, c: (0, 0))],
        out_specs=pl.BlockSpec((tile_rows, 128), lambda i, c: (i, 0)),
        scratch_shapes=[pltpu.VMEM((tile_rows, planes), jnp.float32),
                        pltpu.VMEM((tile_rows, 1), jnp.float32),
                        pltpu.VMEM((tile_rows, planes), jnp.float32),
                        pltpu.VMEM((tile_rows, 1), jnp.float32)],
        compiler_params=pltpu.CompilerParams(
            dimension_semantics=("parallel", "arbitrary"),
            vmem_limit_bytes=vmem_limit_bytes),
    )(student_preds, teacher_preds, new_center)

    n_terms = global_crop_nums * (n_crops - 1)
    # each per-row loss is replicated over 128 lanes (exact power-of-2 divide)
    loss = jnp.sum(partials) / 128.0 / float(n_terms * batch_per_crop)
    return loss, new_center


# ---------------------------------------------------------------------------
# Pure-JAX reference mirroring the PyTorch forward (updated center is used in
# the teacher softmax, as in the module).
# ---------------------------------------------------------------------------
def _dino_loss_ref(student_preds, teacher_preds, center, epoch, *,
                   global_crop_nums=2, local_crop_nums=8,
                   warmup_teacher_temp_epochs=0, teacher_temp=0.04,
                   student_temp=0.1, center_momentum=0.9, device_count=1):
    n_teacher = teacher_preds.shape[0]
    B = n_teacher // global_crop_nums
    if epoch < warmup_teacher_temp_epochs:
        t_temp = epoch / warmup_teacher_temp_epochs * teacher_temp
    else:
        t_temp = teacher_temp
    batch_center = jnp.sum(teacher_preds, axis=0, keepdims=True) / (
        n_teacher * device_count)
    new_center = center * center_momentum + batch_center * (1 - center_momentum)
    t_soft = jax.nn.softmax((teacher_preds - new_center) / t_temp, axis=-1)
    s_logsm = jax.nn.log_softmax(student_preds / student_temp, axis=-1)
    total, n_terms = 0.0, 0
    for ti in range(global_crop_nums):
        tc = t_soft[ti * B:(ti + 1) * B]
        for si in range(global_crop_nums + local_crop_nums):
            if ti == si:
                continue
            sc = s_logsm[si * B:(si + 1) * B]
            total = total + jnp.mean(jnp.sum(-tc * sc, axis=-1))
            n_terms += 1
    return total / n_terms, new_center


if __name__ == "__main__":
    key = jax.random.PRNGKey(0)

    def run_case(planes, G, L, B, epoch, warmup, max_tile_rows=None,
                 seed_offset=0, zero_center=True, dtype=jnp.float32,
                 loss_tol=1e-3, center_tol=1e-4):
        k1, k2, k3 = jax.random.split(jax.random.fold_in(key, seed_offset), 3)
        student = jax.random.normal(k1, ((G + L) * B, planes),
                                    dtype=jnp.float32).astype(dtype)
        teacher = jax.random.normal(k2, (G * B, planes),
                                    dtype=jnp.float32).astype(dtype)
        if zero_center:
            center = jnp.zeros((1, planes), dtype=jnp.float32)
        else:
            center = 0.01 * jax.random.normal(k3, (1, planes), dtype=jnp.float32)

        loss, new_center = dino_loss(
            student, teacher, center, epoch,
            planes=planes, global_crop_nums=G, local_crop_nums=L,
            warmup_teacher_temp_epochs=warmup, teacher_temp=0.04,
            student_temp=0.1, center_momentum=0.9, device_count=1,
            max_tile_rows=max_tile_rows)
        jax.block_until_ready((loss, new_center))

        ref_loss, ref_center = _dino_loss_ref(
            student.astype(jnp.float32), teacher.astype(jnp.float32), center,
            epoch, global_crop_nums=G, local_crop_nums=L,
            warmup_teacher_temp_epochs=warmup, teacher_temp=0.04,
            student_temp=0.1, center_momentum=0.9, device_count=1)
        assert jnp.allclose(loss, ref_loss, rtol=loss_tol, atol=loss_tol), (
            loss, ref_loss)
        assert jnp.allclose(new_center, ref_center, rtol=center_tol,
                            atol=center_tol), "center mismatch"

    # DINO-shaped small case: 2 global + 8 local crops, batch 8 per crop.
    run_case(planes=128, G=2, L=8, B=8, epoch=5, warmup=0)
    # Multi-tile grid (half-batch cap -> 2 row tiles), column-split center
    # kernel (planes=256), warmup teacher-temperature path, nonzero center.
    run_case(planes=256, G=2, L=4, B=16, epoch=5, warmup=10,
             seed_offset=1, zero_center=False)
    # bf16 inputs (halves HBM traffic on v5e/v6e; kernel upcasts to f32).
    run_case(planes=128, G=2, L=2, B=16, epoch=3, warmup=0,
             seed_offset=2, dtype=jnp.bfloat16, loss_tol=2e-2, center_tol=5e-3)

    print("KERNEL_OK")
</pallas_src>

<mosaic_0001>
module attributes {stable_mosaic.version = 11 : i64} {
  func.func @_center_kernel(%arg0: i32, %arg1: i32, %arg2: memref<16x128xf32, #tpu.memory_space<vmem>>, %arg3: memref<1x128xf32, #tpu.memory_space<vmem>>, %arg4: memref<1x128xf32, #tpu.memory_space<vmem>>) attributes {dimension_semantics = [#tpu.dimension_semantics<parallel>, #tpu.dimension_semantics<arbitrary>], iteration_bounds = array<i64: 1, 1>, scalar_prefetch = 0 : i64, scratch_operands = 0 : i64, tpu.core_type = #tpu.core_type<tc>, window_params = [{transform_indices = @transform_0, window_bounds = array<i64: 16, 128>}, {transform_indices = @transform_1, window_bounds = array<i64: 1, 128>}, {transform_indices = @transform_2, window_bounds = array<i64: 1, 128>}]} {
    %c0_i32 = arith.constant 0 : i32
    %0 = arith.cmpi eq, %arg1, %c0_i32 : i32
    %1 = arith.extui %0 : i1 to i32
    %c0_i32_0 = arith.constant 0 : i32
    %2 = arith.cmpi ne, %1, %c0_i32_0 : i32
    scf.if %2 {
      %c0_7 = arith.constant 0 : index
      %c0_8 = arith.constant 0 : index
      %11 = vector.load %arg3[%c0_7, %c0_8] : memref<1x128xf32, #tpu.memory_space<vmem>>, vector<1x128xf32>
      %cst_9 = arith.constant 0.899999976 : f32
      %12 = vector.broadcast %cst_9 : f32 to vector<1x128xf32>
      %13 = arith.mulf %11, %12 : vector<1x128xf32>
      %c0_10 = arith.constant 0 : index
      %c0_11 = arith.constant 0 : index
      %14 = vector.load %arg4[%c0_10, %c0_11] : memref<1x128xf32, #tpu.memory_space<vmem>>, vector<1x128xf32>
      tpu.vector_store %arg4[%c0_10, %c0_11], %13 {strides = array<i32>} : memref<1x128xf32, #tpu.memory_space<vmem>>, vector<1x128xf32>,
    } else {
    }
    %c0 = arith.constant 0 : index
    %c0_1 = arith.constant 0 : index
    %3 = vector.load %arg2[%c0, %c0_1] : memref<16x128xf32, #tpu.memory_space<vmem>>, vector<16x128xf32>
    %cst = arith.constant dense<0.000000e+00> : vector<128xf32>
    %4 = vector.multi_reduction <add>, %3, %cst [0] : vector<16x128xf32> to vector<128xf32>
    %5 = vector.shape_cast %4 : vector<128xf32> to vector<1x128xf32>
    %c0_2 = arith.constant 0 : index
    %c0_3 = arith.constant 0 : index
    %6 = vector.load %arg4[%c0_2, %c0_3] : memref<1x128xf32, #tpu.memory_space<vmem>>, vector<1x128xf32>
    %cst_4 = arith.constant 6.250000e-03 : f32
    %7 = vector.broadcast %cst_4 : f32 to vector<1x128xf32>
    %8 = arith.mulf %5, %7 : vector<1x128xf32>
    %9 = arith.addf %6, %8 : vector<1x128xf32>
    %c0_5 = arith.constant 0 : index
    %c0_6 = arith.constant 0 : index
    %10 = vector.load %arg4[%c0_5, %c0_6] : memref<1x128xf32, #tpu.memory_space<vmem>>, vector<1x128xf32>
    tpu.vector_store %arg4[%c0_5, %c0_6], %9 {strides = array<i32>} : memref<1x128xf32, #tpu.memory_space<vmem>>, vector<1x128xf32>,
    return
  }
  func.func @transform_0(%arg0: i32, %arg1: i32) -> (i32, i32) {
    %c0_i32 = arith.constant 0 : i32
    return %arg1, %arg0 : i32, i32
  }
  func.func @transform_1(%arg0: i32, %arg1: i32) -> (i32, i32) {
    %c0_i32 = arith.constant 0 : i32
    %c0_i32_0 = arith.constant 0 : i32
    return %c0_i32, %arg0 : i32, i32
  }
  func.func @transform_2(%arg0: i32, %arg1: i32) -> (i32, i32) {
    %c0_i32 = arith.constant 0 : i32
    %c0_i32_0 = arith.constant 0 : i32
    return %c0_i32, %arg0 : i32, i32
  }
}

</mosaic_0001>

<bundles_post_ra>
// kernel: tpu_custom_call.1
= control target key start
LH: loop header
LB: loop body
LE: loop exit
PB: predicated region body
PF: predicated region fallthrough
CT: control target
= control target key end

     0   :  { %7 = vsyncpa [#allocation3], 0  ;;  %s192_s0 = inlined_call_operand.hbm [shape: f32[16,128], index: 0, kind: input, shape index: {}]   ;;  %s193_s1 = inlined_call_operand.hbm [shape: f32[1,128], index: 1, kind: input, shape index: {}]   ;;  %s194_s2 = inlined_call_operand.hbm [shape: f32[1,128], index: 2, kind: output, shape index: {}]  }
   0x1   :  { %8 = vsyncpa [#allocation6], 0 }
   0x2   :  { %9 = vsyncpa [#allocation4], 0  ;;  %s14_s11 = sshll.u32 %s192_s0, 4  ;;  %s163_s12 = smov [#allocation2]   ;;  %s15_s11 = int_to_ptr.hbm [resolvable:$true] %s14_s11 }
   0x3   :  { %s16_s13 = sshll.u32 %s163_s12, 4  ;;  %s28_s16 = sshll.u32 %s193_s1, 4  ;;  %s17_s13 = int_to_ptr.vmem [resolvable:$true] %s16_s13  ;;  %s29_s16 = int_to_ptr.hbm [resolvable:$true] %s28_s16 }
   0x4   :  { %s164_s17 = smov 128   ;;  %s165_s18 = smov 8  }
   0x5   :  { %22 = dma.hbm_to_vmem [thread:$0]  %s15_s11, 256, %s17_s13, [#allocation3], %s164_s17, %s164_s17, %s165_s18  }
   0x6   :  { %s166_s19 = smov [#allocation5]  }
   0x7   :  { %s30_s20 = sshll.u32 %s166_s19, 4  ;;  %s31_s20 = int_to_ptr.vmem [resolvable:$true] %s30_s20 }
   0x8   :  { %33 = dma.hbm_to_vmem [thread:$0]  %s29_s16, 16, %s31_s20, [#allocation6]  }
   0x9   :  { %157 = dma.done.wait [#allocation3], 256  }
   0xa   :  { %158 = vsyncadd [#allocation3], 4294967040 }
   0xb   :  { %159 = dma.done.wait [#allocation6], 16  }
   0xc   :  { %160 = vsyncadd [#allocation6], 4294967280  ;;  %v46_v0 = vld [vmem:[#allocation5] sm:$0x1]  ;;  %v49_v1 = vld [vmem:[#allocation2] sm:$0xff]  ;;  %s167_s0 = smov [#allocation7]  }
   0xd   :  { %v50_v2 = vld [vmem:[#allocation2 + $0x8] sm:$0xff]  ;;  %v47_v3 = vmul.f32 0.9, %v46_v0  ;;  %s67_s1 = sshll.u32 %s167_s0, 4  ;;  %s69_s23 = sshll.u32 %s194_s2, 4  ;;  %s68_s1 = int_to_ptr.vmem [resolvable:$true] %s67_s1  ;;  %s70_s23 = int_to_ptr.hbm [resolvable:$true] %s69_s23 }
   0xe   :  { %v51_v4 = vadd.f32 %v50_v2, %v49_v1 }
   0xf   :  { %48 = vst [vmem:[#allocation7] sm:$0x1] %v47_v3 }
  0x10   :  { %v52_v5 = vrot.slane %v51_v4, 4 }
  0x12   :  { %v53_v6 = vadd.f32 %v52_v5, %v51_v4 }
  0x14   :  { %v54_v7 = vrot.slane %v53_v6, 2 }
  0x16   :  { %v55_v8 = vadd.f32 %v54_v7, %v53_v6  ;;  %v58_v11 = vld [vmem:[#allocation7] sm:$0x1] }
  0x18   :  { %v56_v9 = vrot.slane %v55_v8, 1 }
  0x1a   :  { %v57_v10 = vadd.f32 %v56_v9, %v55_v8 }
  0x1c   :  { %v59_v12 = vmul.f32 0.00625, %v57_v10 }
  0x1e   :  { %v60_v13 = vadd.f32 %v59_v12, %v58_v11 }
  0x20   :  { %61 = vst [vmem:[#allocation7] sm:$0x1] %v60_v13 }
  0x21   :  { %72 = dma.vmem_to_hbm [thread:$0]  %s68_s1, 16, %s70_s23, [#allocation4]  }
  0x22   :  { %161 = dma.done.wait [#allocation4], 16  }
  0x23   :  { %162 = vsyncadd [#allocation4], 4294967280 }
  0x24   :  { %77 = vsyncpa [#allocation3], 1 }
  0x25   :  { %78 = vsyncpa [#allocation6], 1 }
  0x26   :  { %79 = vsyncpa [#allocation4], 1 }

</bundles_post_ra>
